<compile_context>
chip_gen: v6e
topology: v6e:2x2x1
jax: 0.10.0
libtpu: 0.0.40
codegen_flags: <defaults>
</compile_context>

<pallas_src>
import functools

import jax
import jax.numpy as jnp
from jax.experimental import pallas as pl
from jax.experimental.pallas import tpu as pltpu


def _reg_l1_kernel(x_ref, ind_ref, tgt_ref, msk_ref, num_ref, *, hw_chunk):
    # x_ref   : VMEM (Bt, C, HW)   feature slab, native dtype
    # ind_ref : VMEM (Bt, 1, Kp)   gather indices (int32, lane axis = K)
    # tgt_ref : VMEM (Bt, C, Kp)   target transposed so K sits on lanes (f32)
    # msk_ref : VMEM (Bt, 1, Kp)   mask (f32, zero-padded lanes)
    # num_ref : VMEM (Bt, 1, Kp)   per-batch, per-lane partial |diff| sums (out)
    Bt, C, HW = x_ref.shape
    _, _, Kp = tgt_ref.shape

    idx = ind_ref[...]                      # (Bt, 1, Kp) int32
    m = msk_ref[...]                        # (Bt, 1, Kp) f32
    tgt = tgt_ref[...]                      # (Bt, C, Kp) f32

    # One-hot MXU gather, chunked over the spatial axis so the one-hot selector
    # stays small:  pred[b, c, k] = x[b, c, ind[b, k]].
    pred = jnp.zeros((Bt, C, Kp), jnp.float32)
    for lo in range(0, HW, hw_chunk):
        hi = min(lo + hw_chunk, HW)
        s = hi - lo
        x_chunk = x_ref[:, :, lo:hi]                                     # (Bt, C, s)
        iota = jax.lax.broadcasted_iota(jnp.int32, (1, s, Kp), 1) + lo   # (1, s, Kp)
        onehot = (iota == idx).astype(x_chunk.dtype)                     # (Bt, s, Kp)
        pred = pred + jnp.einsum(
            "bcs,bsk->bck", x_chunk, onehot,
            preferred_element_type=jnp.float32)

    # Masked L1 (matches F.l1_loss(pred*mask, target*mask, reduction='sum')).
    diff = jnp.abs(pred * m - tgt * m)                                   # (Bt, C, Kp)
    # Only a sublane (C) reduction per step; the cross-lane/cross-batch sum and
    # the divide are done in JAX outside the kernel (keeps batch axis parallel).
    num_ref[...] = jnp.sum(diff, axis=1, keepdims=True)                  # (Bt, 1, Kp)


@jax.jit
def reg_l1_loss(output, mask, ind, target):
    """RegL1Loss.forward.

    output: (B, C, H, W), mask: (B, K), ind: (B, K) int, target: (B, K, C).
    """
    B, C, H, W = output.shape
    K = ind.shape[1]
    HW = H * W

    # Features stay in native dtype (no full-map cast / transpose in the wrapper);
    # reshape (B,C,H,W)->(B,C,H*W) is free.
    x = output.reshape(B, C, HW)
    if not jnp.issubdtype(x.dtype, jnp.floating):
        x = x.astype(jnp.float32)

    # Pad K up to a multiple of 128 so K is lane-dense; padded lanes get mask=0
    # (and target=0), so they contribute exactly nothing.
    Kp = max(128, ((K + 127) // 128) * 128)
    pad = Kp - K

    tgt_t = jnp.transpose(target.astype(jnp.float32), (0, 2, 1))   # (B, C, K) -- tiny
    msk = mask.astype(jnp.float32)                                  # (B, K)
    ind32 = jnp.clip(ind.astype(jnp.int32), 0, HW - 1)              # guard OOB sentinels
    if pad:
        tgt_t = jnp.pad(tgt_t, ((0, 0), (0, 0), (0, pad)))
        msk = jnp.pad(msk, ((0, 0), (0, pad)))
        ind32 = jnp.pad(ind32, ((0, 0), (0, pad)))
    msk3 = msk.reshape(B, 1, Kp)
    ind3 = ind32.reshape(B, 1, Kp)

    # Batches per grid step: amortize per-step overhead while keeping the
    # double-buffered feature slab (and the one-hot temporaries) small enough
    # for v7x's tighter VMEM.
    hw_chunk = min(HW, 512)
    itemsize = jnp.dtype(x.dtype).itemsize
    slab_budget = 4 * 1024 * 1024
    Bt = 1
    for cand in range(1, min(B, 8) + 1):
        slab_bytes = 2 * cand * C * HW * itemsize            # double-buffered slab
        tmp_bytes = cand * hw_chunk * Kp * 4                 # one-hot selector
        if B % cand == 0 and slab_bytes + tmp_bytes <= slab_budget:
            Bt = cand

    num_part = pl.pallas_call(
        functools.partial(_reg_l1_kernel, hw_chunk=hw_chunk),
        out_shape=jax.ShapeDtypeStruct((B, 1, Kp), jnp.float32),
        grid=(B // Bt,),
        in_specs=[
            pl.BlockSpec((Bt, C, HW), lambda b: (b, 0, 0)),   # feature slab (native dtype)
            pl.BlockSpec((Bt, 1, Kp), lambda b: (b, 0, 0)),   # indices
            pl.BlockSpec((Bt, C, Kp), lambda b: (b, 0, 0)),   # target^T
            pl.BlockSpec((Bt, 1, Kp), lambda b: (b, 0, 0)),   # mask
        ],
        out_specs=pl.BlockSpec((Bt, 1, Kp), lambda b: (b, 0, 0)),
        compiler_params=pltpu.CompilerParams(
            dimension_semantics=("parallel",)),               # megacore-friendly, no shared acc
    )(x, ind3, tgt_t, msk3)

    num = jnp.sum(num_part)
    den = jnp.sum(mask.astype(jnp.float32)) * C + 1e-4        # mask expanded over C, then summed
    return num / den


def reg_l1_loss_ref(output, mask, ind, target):
    """Pure-JAX reference mirroring the PyTorch module."""
    B, C, H, W = output.shape
    x = output.reshape(B, C, H * W)
    pred = jnp.take_along_axis(x, ind[:, None, :].astype(jnp.int32), axis=2)  # (B, C, K)
    pred = jnp.transpose(pred, (0, 2, 1))                                     # (B, K, C)
    m = mask.astype(jnp.float32)[:, :, None]
    num = jnp.sum(jnp.abs(pred * m - target * m))
    den = jnp.sum(jnp.broadcast_to(m, pred.shape)) + 1e-4
    return num / den


if __name__ == "__main__":
    key = jax.random.PRNGKey(0)
    k1, k2, k3, k4 = jax.random.split(key, 4)
    B, C, H, W, K = 2, 4, 16, 16, 8

    output = jax.random.normal(k1, (B, C, H, W), jnp.float32)
    target = jax.random.normal(k2, (B, K, C), jnp.float32)
    ind = jax.random.randint(k3, (B, K), 0, H * W, jnp.int32)
    mask = (jax.random.uniform(k4, (B, K)) > 0.3).astype(jnp.float32)

    loss = reg_l1_loss(output, mask, ind, target)
    jax.block_until_ready(loss)

    ref = reg_l1_loss_ref(output, mask, ind, target)
    assert jnp.allclose(loss, ref, rtol=1e-5, atol=1e-5), (float(loss), float(ref))
    print("KERNEL_OK")
</pallas_src>

<mosaic_0001>
module attributes {stable_mosaic.version = 11 : i64} {
  func.func @_reg_l1_kernel(%arg0: i32, %arg1: memref<2x4x256xf32, #tpu.memory_space<vmem>>, %arg2: memref<2x1x128xi32, #tpu.memory_space<vmem>>, %arg3: memref<2x4x128xf32, #tpu.memory_space<vmem>>, %arg4: memref<2x1x128xf32, #tpu.memory_space<vmem>>, %arg5: memref<2x1x128xf32, #tpu.memory_space<vmem>>) attributes {dimension_semantics = [#tpu.dimension_semantics<parallel>], iteration_bounds = array<i64: 1>, scalar_prefetch = 0 : i64, scratch_operands = 0 : i64, tpu.core_type = #tpu.core_type<tc>, window_params = [{transform_indices = @transform_0, window_bounds = array<i64: 2, 4, 256>}, {transform_indices = @transform_1, window_bounds = array<i64: 2, 1, 128>}, {transform_indices = @transform_2, window_bounds = array<i64: 2, 4, 128>}, {transform_indices = @transform_3, window_bounds = array<i64: 2, 1, 128>}, {transform_indices = @transform_4, window_bounds = array<i64: 2, 1, 128>}]} {
    %c0 = arith.constant 0 : index
    %c0_0 = arith.constant 0 : index
    %c0_1 = arith.constant 0 : index
    %0 = vector.load %arg2[%c0, %c0_0, %c0_1] : memref<2x1x128xi32, #tpu.memory_space<vmem>>, vector<2x1x128xi32>
    %c0_2 = arith.constant 0 : index
    %c0_3 = arith.constant 0 : index
    %c0_4 = arith.constant 0 : index
    %1 = vector.load %arg4[%c0_2, %c0_3, %c0_4] : memref<2x1x128xf32, #tpu.memory_space<vmem>>, vector<2x1x128xf32>
    %c0_5 = arith.constant 0 : index
    %c0_6 = arith.constant 0 : index
    %c0_7 = arith.constant 0 : index
    %2 = vector.load %arg3[%c0_5, %c0_6, %c0_7] : memref<2x4x128xf32, #tpu.memory_space<vmem>>, vector<2x4x128xf32>
    %cst = arith.constant 0.000000e+00 : f32
    %3 = vector.broadcast %cst : f32 to vector<2x4x128xf32>
    %c0_8 = arith.constant 0 : index
    %c0_9 = arith.constant 0 : index
    %c0_10 = arith.constant 0 : index
    %4 = vector.load %arg1[%c0_8, %c0_9, %c0_10] : memref<2x4x256xf32, #tpu.memory_space<vmem>>, vector<2x4x256xf32>
    %5 = tpu.iota {dimensions = array<i32: 1>} : vector<1x256x128xi32>
    %c0_i32 = arith.constant 0 : i32
    %6 = vector.broadcast %c0_i32 : i32 to vector<1x256x128xi32>
    %7 = arith.addi %5, %6 : vector<1x256x128xi32>
    %8 = vector.broadcast %7 : vector<1x256x128xi32> to vector<2x256x128xi32>
    %9 = vector.broadcast %0 : vector<2x1x128xi32> to vector<2x256x128xi32>
    %10 = arith.cmpi eq, %8, %9 : vector<2x256x128xi32>
    %11 = arith.extui %10 : vector<2x256x128xi1> to vector<2x256x128xi32>
    %12 = arith.sitofp %11 : vector<2x256x128xi32> to vector<2x256x128xf32>
    "tpu.trace_start"() <{level = 10 : i32, message = "bcs,bsk->bck"}> : () -> ()
    %cst_11 = arith.constant dense<0.000000e+00> : vector<2x4x128xf32>
    %13 = tpu.matmul %4, %12, %cst_11 {dimension_numbers = #tpu.dot_dimension_numbers<[2], [1], [1], [2], [0, 0, 0, 1, 1, 2], [0], [0]>} : vector<2x4x256xf32>, vector<2x256x128xf32>, vector<2x4x128xf32> -> vector<2x4x128xf32>
    "tpu.trace_stop"() : () -> ()
    %14 = arith.addf %3, %13 : vector<2x4x128xf32>
    %15 = vector.broadcast %1 : vector<2x1x128xf32> to vector<2x4x128xf32>
    %16 = arith.mulf %14, %15 : vector<2x4x128xf32>
    %17 = vector.broadcast %1 : vector<2x1x128xf32> to vector<2x4x128xf32>
    %18 = arith.mulf %2, %17 : vector<2x4x128xf32>
    %19 = arith.subf %16, %18 : vector<2x4x128xf32>
    %20 = math.absf %19 : vector<2x4x128xf32>
    %cst_12 = arith.constant dense<0.000000e+00> : vector<2x128xf32>
    %21 = vector.multi_reduction <add>, %20, %cst_12 [1] : vector<2x4x128xf32> to vector<2x128xf32>
    %22 = vector.shape_cast %21 : vector<2x128xf32> to vector<2x1x128xf32>
    %c0_13 = arith.constant 0 : index
    %c0_14 = arith.constant 0 : index
    %c0_15 = arith.constant 0 : index
    %23 = vector.load %arg5[%c0_13, %c0_14, %c0_15] : memref<2x1x128xf32, #tpu.memory_space<vmem>>, vector<2x1x128xf32>
    tpu.vector_store %arg5[%c0_13, %c0_14, %c0_15], %22 {strides = array<i32>} : memref<2x1x128xf32, #tpu.memory_space<vmem>>, vector<2x1x128xf32>,
    return
  }
  func.func @transform_0(%arg0: i32) -> (i32, i32, i32) {
    %c0_i32 = arith.constant 0 : i32
    %c0_i32_0 = arith.constant 0 : i32
    %c0_i32_1 = arith.constant 0 : i32
    return %arg0, %c0_i32, %c0_i32_0 : i32, i32, i32
  }
  func.func @transform_1(%arg0: i32) -> (i32, i32, i32) {
    %c0_i32 = arith.constant 0 : i32
    %c0_i32_0 = arith.constant 0 : i32
    %c0_i32_1 = arith.constant 0 : i32
    return %arg0, %c0_i32, %c0_i32_0 : i32, i32, i32
  }
  func.func @transform_2(%arg0: i32) -> (i32, i32, i32) {
    %c0_i32 = arith.constant 0 : i32
    %c0_i32_0 = arith.constant 0 : i32
    %c0_i32_1 = arith.constant 0 : i32
    return %arg0, %c0_i32, %c0_i32_0 : i32, i32, i32
  }
  func.func @transform_3(%arg0: i32) -> (i32, i32, i32) {
    %c0_i32 = arith.constant 0 : i32
    %c0_i32_0 = arith.constant 0 : i32
    %c0_i32_1 = arith.constant 0 : i32
    return %arg0, %c0_i32, %c0_i32_0 : i32, i32, i32
  }
  func.func @transform_4(%arg0: i32) -> (i32, i32, i32) {
    %c0_i32 = arith.constant 0 : i32
    %c0_i32_0 = arith.constant 0 : i32
    %c0_i32_1 = arith.constant 0 : i32
    return %arg0, %c0_i32, %c0_i32_0 : i32, i32, i32
  }
}

</mosaic_0001>

<bundles_post_ra>
// kernel: reg_l1_loss.1
= control target key start
LH: loop header
LB: loop body
LE: loop exit
PB: predicated region body
PF: predicated region fallthrough
CT: control target
= control target key end

     0   :  { %v25_v0 = vlaneseq  ;;  %v650_v15 = vmov 1.0   ;;  %s883_s1 = inlined_call_operand.vmem [shape: s32[2,1,128], index: 1, kind: input, shape index: {}]   ;;  %s884_s0 = inlined_call_operand.vmem [shape: f32[2,4,256], index: 0, kind: input, shape index: {}]   ;;  %s885_s3 = inlined_call_operand.vmem [shape: f32[2,1,128], index: 3, kind: input, shape index: {}]   ;;  %s886_s2 = inlined_call_operand.vmem [shape: f32[2,4,128], index: 2, kind: input, shape index: {}]   ;;  %s887_s4 = inlined_call_operand.vmem [shape: f32[2,1,128], index: 4, kind: output, shape index: {}]  }
   0x1   :  { %v679_v1 = vld [vmem:[%s884_s0] sm:$0xff]  ;;  %v688_v4 = vld [vmem:[%s884_s0 + $0x8] sm:$0xff] }
   0x2   :  { %v681_v2 = vshrl.u32 %v25_v0, 7  ;;  %v259_v3 = vcombine.high %v679_v1, %v679_v1  ;;  %v693_v5 = vld [vmem:[%s883_s1] ss:$0 sm:$0xff]  ;;  %v698_v6 = vld [vmem:[%s883_s1 + $0x1] ss:$0 sm:$0xff]  ;;  %v332_v7 = vcombine.high %v688_v4, %v688_v4 }
   0x3   :  { %v575_v40 = vld [vmem:[%s885_s3] ss:$0 sm:$0xff]  ;;  %v576_v44 = vld [vmem:[%s885_s3 + $0x1] ss:$0 sm:$0xff]  ;;  %v22_v45 = vld [vmem:[%s886_s2 + $0x4] sm:$0xf] }
   0x4   :  { %v57_v8 = vadd.s32 248, %v681_v2  ;;  %v41_v9 = vadd.s32 120, %v681_v2  ;;  %v56_v10 = vadd.s32 240, %v681_v2  ;;  %v40_v11 = vadd.s32 112, %v681_v2  ;;  %325 = vmatprep.mubr.f32.mxu0 %v259_v3  ;;  %398 = vmatprep.mubr.f32.mxu1 %v332_v7  ;;  %v21_v43 = vld [vmem:[%s886_s2] sm:$0xf] }
   0x5   :  { %v55_v12 = vadd.s32 232, %v681_v2  ;;  %v39_v13 = vadd.s32 104, %v681_v2  ;;  %v54_v14 = vadd.s32 224, %v681_v2  ;;  %v38_v16 = vadd.s32 96, %v681_v2 }
   0x6   :  { %vm97_vm0 = vcmp.eq.s32.totalorder %v57_v8, %v693_v5  ;;  %vm129_vm1 = vcmp.eq.s32.totalorder %v57_v8, %v698_v6  ;;  %vm81_vm2 = vcmp.eq.s32.totalorder %v41_v9, %v693_v5  ;;  %vm113_vm3 = vcmp.eq.s32.totalorder %v41_v9, %v698_v6 }
   0x7   :  { %577 = vmatprep.subr.msk.mxu0 %vm97_vm0, %v650_v15  ;;  %612 = vmatprep.subr.msk.mxu1 %vm129_vm1, %v650_v15  ;;  %vm96_vm4 = vcmp.eq.s32.totalorder %v56_v10, %v693_v5  ;;  %vm128_vm5 = vcmp.eq.s32.totalorder %v56_v10, %v698_v6  ;;  %vm80_vm6 = vcmp.eq.s32.totalorder %v40_v11, %v693_v5  ;;  %v53_v17 = vadd.s32 216, %v681_v2 }
   0x8   :  { %578 = vmatpush3.msk.msra.mxu0 %vm81_vm2, %v650_v15  ;;  %613 = vmatpush3.msk.msra.mxu1 %vm113_vm3, %v650_v15  ;;  %vm112_vm7 = vcmp.eq.s32.totalorder %v40_v11, %v698_v6  ;;  %vm95_vm8 = vcmp.eq.s32.totalorder %v55_v12, %v693_v5  ;;  %vm127_vm9 = vcmp.eq.s32.totalorder %v55_v12, %v698_v6  ;;  %v37_v18 = vadd.s32 88, %v681_v2 }
   0x9   :  { %579 = vmatprep.subr.msk.mxu0 %vm96_vm4, %v650_v15  ;;  %614 = vmatprep.subr.msk.mxu1 %vm128_vm5, %v650_v15  ;;  %vm79_vm10 = vcmp.eq.s32.totalorder %v39_v13, %v693_v5  ;;  %vm111_vm11 = vcmp.eq.s32.totalorder %v39_v13, %v698_v6  ;;  %vm94_vm12 = vcmp.eq.s32.totalorder %v54_v14, %v693_v5  ;;  %v52_v19 = vadd.s32 208, %v681_v2 }
   0xa   :  { %580 = vmatpush3.msk.msra.mxu0 %vm80_vm6, %v650_v15  ;;  %615 = vmatpush3.msk.msra.mxu1 %vm112_vm7, %v650_v15  ;;  %vm126_vm13 = vcmp.eq.s32.totalorder %v54_v14, %v698_v6  ;;  %vm78_vm14 = vcmp.eq.s32.totalorder %v38_v16, %v693_v5  ;;  %vm110_vm15 = vcmp.eq.s32.totalorder %v38_v16, %v698_v6  ;;  %v36_v20 = vadd.s32 80, %v681_v2 }
   0xb   :  { %581 = vmatprep.subr.msk.mxu0 %vm95_vm8, %v650_v15  ;;  %616 = vmatprep.subr.msk.mxu1 %vm127_vm9, %v650_v15  ;;  %vm93_vm0 = vcmp.eq.s32.totalorder %v53_v17, %v693_v5  ;;  %vm125_vm1 = vcmp.eq.s32.totalorder %v53_v17, %v698_v6  ;;  %v51_v21 = vadd.s32 200, %v681_v2  ;;  %vm77_vm2 = vcmp.eq.s32.totalorder %v37_v18, %v693_v5 }
   0xc   :  { %582 = vmatpush3.msk.msra.mxu0 %vm79_vm10, %v650_v15  ;;  %617 = vmatpush3.msk.msra.mxu1 %vm111_vm11, %v650_v15  ;;  %vm109_vm3 = vcmp.eq.s32.totalorder %v37_v18, %v698_v6  ;;  %v35_v22 = vadd.s32 72, %v681_v2  ;;  %vm92_vm4 = vcmp.eq.s32.totalorder %v52_v19, %v693_v5  ;;  %vm124_vm5 = vcmp.eq.s32.totalorder %v52_v19, %v698_v6 }
   0xd   :  { %583 = vmatprep.subr.msk.mxu0 %vm94_vm12, %v650_v15  ;;  %618 = vmatprep.subr.msk.mxu1 %vm126_vm13, %v650_v15  ;;  %v50_v23 = vadd.s32 192, %v681_v2  ;;  %vm76_vm6 = vcmp.eq.s32.totalorder %v36_v20, %v693_v5  ;;  %vm108_vm7 = vcmp.eq.s32.totalorder %v36_v20, %v698_v6  ;;  %v34_v24 = vadd.s32 64, %v681_v2 }
   0xe   :  { %584 = vmatpush3.msk.msra.mxu0 %vm78_vm14, %v650_v15  ;;  %619 = vmatpush3.msk.msra.mxu1 %vm110_vm15, %v650_v15  ;;  %vm91_vm8 = vcmp.eq.s32.totalorder %v51_v21, %v693_v5  ;;  %vm123_vm9 = vcmp.eq.s32.totalorder %v51_v21, %v698_v6  ;;  %v49_v25 = vadd.s32 184, %v681_v2  ;;  %vm75_vm10 = vcmp.eq.s32.totalorder %v35_v22, %v693_v5 }
   0xf   :  { %585 = vmatprep.subr.msk.mxu0 %vm93_vm0, %v650_v15  ;;  %620 = vmatprep.subr.msk.mxu1 %vm125_vm1, %v650_v15  ;;  %vm107_vm11 = vcmp.eq.s32.totalorder %v35_v22, %v698_v6  ;;  %v33_v26 = vadd.s32 56, %v681_v2  ;;  %vm90_vm12 = vcmp.eq.s32.totalorder %v50_v23, %v693_v5  ;;  %vm122_vm13 = vcmp.eq.s32.totalorder %v50_v23, %v698_v6 }
  0x10   :  { %586 = vmatpush3.msk.msra.mxu0 %vm77_vm2, %v650_v15  ;;  %621 = vmatpush3.msk.msra.mxu1 %vm109_vm3, %v650_v15  ;;  %v48_v27 = vadd.s32 176, %v681_v2  ;;  %vm74_vm14 = vcmp.eq.s32.totalorder %v34_v24, %v693_v5  ;;  %vm106_vm15 = vcmp.eq.s32.totalorder %v34_v24, %v698_v6  ;;  %v32_v28 = vadd.s32 48, %v681_v2 }
  0x11   :  { %587 = vmatprep.subr.msk.mxu0 %vm92_vm4, %v650_v15  ;;  %622 = vmatprep.subr.msk.mxu1 %vm124_vm5, %v650_v15  ;;  %vm89_vm0 = vcmp.eq.s32.totalorder %v49_v25, %v693_v5  ;;  %vm121_vm1 = vcmp.eq.s32.totalorder %v49_v25, %v698_v6  ;;  %v47_v29 = vadd.s32 168, %v681_v2  ;;  %vm73_vm2 = vcmp.eq.s32.totalorder %v33_v26, %v693_v5 }
  0x12   :  { %588 = vmatpush3.msk.msra.mxu0 %vm76_vm6, %v650_v15  ;;  %623 = vmatpush3.msk.msra.mxu1 %vm108_vm7, %v650_v15  ;;  %vm105_vm3 = vcmp.eq.s32.totalorder %v33_v26, %v698_v6  ;;  %v31_v30 = vadd.s32 40, %v681_v2  ;;  %vm88_vm4 = vcmp.eq.s32.totalorder %v48_v27, %v693_v5  ;;  %vm120_vm5 = vcmp.eq.s32.totalorder %v48_v27, %v698_v6 }
  0x13   :  { %589 = vmatprep.subr.msk.mxu0 %vm91_vm8, %v650_v15  ;;  %624 = vmatprep.subr.msk.mxu1 %vm123_vm9, %v650_v15  ;;  %v46_v31 = vadd.s32 160, %v681_v2  ;;  %vm72_vm6 = vcmp.eq.s32.totalorder %v32_v28, %v693_v5  ;;  %vm104_vm7 = vcmp.eq.s32.totalorder %v32_v28, %v698_v6  ;;  %v30_v32 = vadd.s32 32, %v681_v2 }
  0x14   :  { %590 = vmatpush3.msk.msra.mxu0 %vm75_vm10, %v650_v15  ;;  %625 = vmatpush3.msk.msra.mxu1 %vm107_vm11, %v650_v15  ;;  %vm87_vm8 = vcmp.eq.s32.totalorder %v47_v29, %v693_v5  ;;  %vm119_vm9 = vcmp.eq.s32.totalorder %v47_v29, %v698_v6  ;;  %v45_v33 = vadd.s32 152, %v681_v2  ;;  %vm71_vm10 = vcmp.eq.s32.totalorder %v31_v30, %v693_v5 }
  0x15   :  { %591 = vmatprep.subr.msk.mxu0 %vm90_vm12, %v650_v15  ;;  %626 = vmatprep.subr.msk.mxu1 %vm122_vm13, %v650_v15  ;;  %vm103_vm11 = vcmp.eq.s32.totalorder %v31_v30, %v698_v6  ;;  %v29_v34 = vadd.s32 24, %v681_v2  ;;  %vm86_vm12 = vcmp.eq.s32.totalorder %v46_v31, %v693_v5  ;;  %vm118_vm13 = vcmp.eq.s32.totalorder %v46_v31, %v698_v6 }
  0x16   :  { %592 = vmatpush3.msk.msra.mxu0 %vm74_vm14, %v650_v15  ;;  %627 = vmatpush3.msk.msra.mxu1 %vm106_vm15, %v650_v15  ;;  %v44_v35 = vadd.s32 144, %v681_v2  ;;  %vm70_vm14 = vcmp.eq.s32.totalorder %v30_v32, %v693_v5  ;;  %vm102_vm15 = vcmp.eq.s32.totalorder %v30_v32, %v698_v6  ;;  %v28_v36 = vadd.s32 16, %v681_v2 }
  0x17   :  { %593 = vmatprep.subr.msk.mxu0 %vm89_vm0, %v650_v15  ;;  %628 = vmatprep.subr.msk.mxu1 %vm121_vm1, %v650_v15  ;;  %vm85_vm0 = vcmp.eq.s32.totalorder %v45_v33, %v693_v5  ;;  %vm117_vm1 = vcmp.eq.s32.totalorder %v45_v33, %v698_v6  ;;  %v43_v37 = vadd.s32 136, %v681_v2  ;;  %v27_v38 = vadd.s32 8, %v681_v2 }
  0x18   :  { %594 = vmatpush3.msk.msra.mxu0 %vm73_vm2, %v650_v15  ;;  %629 = vmatpush3.msk.msra.mxu1 %vm105_vm3, %v650_v15  ;;  %vm69_vm2 = vcmp.eq.s32.totalorder %v29_v34, %v693_v5  ;;  %vm101_vm3 = vcmp.eq.s32.totalorder %v29_v34, %v698_v6  ;;  %v42_v39 = vadd.s32 128, %v681_v2  ;;  %v418_v49 = vmul.f32 %v575_v40, %v21_v43 }
  0x19   :  { %595 = vmatprep.subr.msk.mxu0 %vm88_vm4, %v650_v15  ;;  %630 = vmatprep.subr.msk.mxu1 %vm120_vm5, %v650_v15  ;;  %vm84_vm4 = vcmp.eq.s32.totalorder %v44_v35, %v693_v5  ;;  %vm116_vm5 = vcmp.eq.s32.totalorder %v44_v35, %v698_v6  ;;  %v419_v51 = vmul.f32 %v576_v44, %v22_v45 }
  0x1a   :  { %596 = vmatpush3.msk.msra.mxu0 %vm72_vm6, %v650_v15  ;;  %631 = vmatpush3.msk.msra.mxu1 %vm104_vm7, %v650_v15  ;;  %vm68_vm6 = vcmp.eq.s32.totalorder %v28_v36, %v693_v5  ;;  %vm100_vm7 = vcmp.eq.s32.totalorder %v28_v36, %v698_v6 }
  0x1b   :  { %597 = vmatprep.subr.msk.mxu0 %vm87_vm8, %v650_v15  ;;  %632 = vmatprep.subr.msk.mxu1 %vm119_vm9, %v650_v15  ;;  %vm83_vm8 = vcmp.eq.s32.totalorder %v43_v37, %v693_v5  ;;  %vm115_vm9 = vcmp.eq.s32.totalorder %v43_v37, %v698_v6 }
  0x1c   :  { %598 = vmatpush3.msk.msra.mxu0 %vm71_vm10, %v650_v15  ;;  %633 = vmatpush3.msk.msra.mxu1 %vm103_vm11, %v650_v15  ;;  %vm67_vm10 = vcmp.eq.s32.totalorder %v27_v38, %v693_v5  ;;  %vm99_vm11 = vcmp.eq.s32.totalorder %v27_v38, %v698_v6 }
  0x1d   :  { %599 = vmatprep.subr.msk.mxu0 %vm86_vm12, %v650_v15  ;;  %634 = vmatprep.subr.msk.mxu1 %vm118_vm13, %v650_v15  ;;  %vm82_vm12 = vcmp.eq.s32.totalorder %v42_v39, %v693_v5  ;;  %vm114_vm13 = vcmp.eq.s32.totalorder %v42_v39, %v698_v6 }
  0x1e   :  { %600 = vmatpush3.msk.msra.mxu0 %vm70_vm14, %v650_v15  ;;  %635 = vmatpush3.msk.msra.mxu1 %vm102_vm15, %v650_v15  ;;  %vm66_vm14 = vcmp.eq.s32.totalorder %v681_v2, %v693_v5  ;;  %vm98_vm15 = vcmp.eq.s32.totalorder %v681_v2, %v698_v6 }
  0x1f   :  { %601 = vmatprep.subr.msk.mxu0 %vm85_vm0, %v650_v15  ;;  %636 = vmatprep.subr.msk.mxu1 %vm117_vm1, %v650_v15  ;;  %vm424_vm0 = vcmask 1043456  }
  0x20   :  { %602 = vmatpush3.msk.msra.mxu0 %vm69_vm2, %v650_v15  ;;  %637 = vmatpush3.msk.msra.mxu1 %vm101_vm3, %v650_v15 }
  0x21   :  { %603 = vmatprep.subr.msk.mxu0 %vm84_vm4, %v650_v15  ;;  %638 = vmatprep.subr.msk.mxu1 %vm116_vm5, %v650_v15 }
  0x22   :  { %604 = vmatpush3.msk.msra.mxu0 %vm68_vm6, %v650_v15  ;;  %639 = vmatpush3.msk.msra.mxu1 %vm100_vm7, %v650_v15 }
  0x23   :  { %605 = vmatprep.subr.msk.mxu0 %vm83_vm8, %v650_v15  ;;  %640 = vmatprep.subr.msk.mxu1 %vm115_vm9, %v650_v15 }
  0x24   :  { %606 = vmatpush3.msk.msra.mxu0 %vm67_vm10, %v650_v15  ;;  %641 = vmatpush3.msk.msra.mxu1 %vm99_vm11, %v650_v15 }
  0x25   :  { %607 = vmatprep.subr.msk.mxu0 %vm82_vm12, %v650_v15  ;;  %642 = vmatprep.subr.msk.mxu1 %vm114_vm13, %v650_v15 }
  0x26   :  { %608 = vmatpush3.msk.msra.mxu0 %vm66_vm14, %v650_v15  ;;  %643 = vmatpush3.msk.msra.mxu1 %vm98_vm15, %v650_v15 }
  0x27   :  { %326 = vmatmul.mubr.f32.vlgmr.msra.gmra.mxu0 %v679_v1  ;;  %399 = vmatmul.mubr.f32.vlgmr.msra.gmra.mxu1 %v688_v4 }
  0xe7   :  { %v609_v41 = vpop.f32.mrf.mxu0  ;;  %v644_v42 = vpop.f32.mrf.mxu1 }
  0xe9   :  { %v610_v46 = vpop.f32.mrf.mxu0  ;;  %v645_v47 = vpop.f32.mrf.mxu1 }
  0xea   :  { %v611_v48 = vadd.f32 %v610_v46, %v609_v41  ;;  %v646_v50 = vadd.f32 %v645_v47, %v644_v42 }
  0xec   :  { %v416_v52 = vmul.f32 %v611_v48, %v575_v40  ;;  %v417_v53 = vmul.f32 %v646_v50, %v576_v44 }
  0xee   :  { %v420_v54 = vsub.f32 %v416_v52, %v418_v49  ;;  %v421_v55 = vsub.f32 %v417_v53, %v419_v51 }
  0xf0   :  { %v422_v56 = vand.u32 2147483647, %v420_v54  ;;  %v423_v57 = vand.u32 2147483647, %v421_v55 }
  0xf2   :  { %v425_v58 = vsel %vm424_vm0, %v422_v56, 0.0  ;;  %v432_v59 = vsel %vm424_vm0, %v423_v57, 0.0 }
  0xf3   :  { %v426_v60 = vrot.slane %v425_v58, 4  ;;  %v433_v61 = vrot.slane %v432_v59, 4 }
  0xf5   :  { %v427_v62 = vadd.f32 %v426_v60, %v425_v58  ;;  %v434_v63 = vadd.f32 %v433_v61, %v432_v59 }
  0xf7   :  { %v428_v0 = vrot.slane %v427_v62, 2  ;;  %v435_v1 = vrot.slane %v434_v63, 2 }
  0xf9   :  { %v429_v2 = vadd.f32 %v428_v0, %v427_v62  ;;  %v436_v3 = vadd.f32 %v435_v1, %v434_v63 }
  0xfb   :  { %v430_v4 = vrot.slane %v429_v2, 1  ;;  %v437_v5 = vrot.slane %v436_v3, 1 }
  0xfd   :  { %v431_v6 = vadd.f32 %v430_v4, %v429_v2  ;;  %v438_v7 = vadd.f32 %v437_v5, %v436_v3 }
  0xff   :  { %439 = vst [vmem:[%s887_s4] sm:$0x1] %v431_v6  ;;  %440 = vst [vmem:[%s887_s4 + $0x1] sm:$0x1] %v438_v7 }

</bundles_post_ra>
